<compile_context>
chip_gen: v7x
topology: tpu7x:2x2x1
jax: 0.10.0
libtpu: 0.0.40
codegen_flags: <defaults>
</compile_context>

<pallas_src>
import math

import numpy as np
import jax
import jax.numpy as jnp
from jax.experimental import pallas as pl
from jax.experimental.pallas import tpu as pltpu


# --------------------------------------------------------------------------
# Module "init" helpers (plain Python / numpy glue)
# --------------------------------------------------------------------------
def calc_radius(n):
    return 1.0 / math.cos(math.pi / (2 * n))


def chebyshev_nodes(n, a, b):
    # Chebyshev nodes of the first kind on [a, b]:
    #   t_k = (a+b)/2 + (b-a)/2 * cos(pi*(2k+1)/(2n)),  k = 0..n-1
    k = np.arange(n, dtype=np.float64)
    t = np.cos(math.pi * (2.0 * k + 1.0) / (2.0 * n))
    return 0.5 * (a + b) + 0.5 * (b - a) * t  # shape (n,)


def lagrange_to_monomial(nodes):
    """(n, n) matrix: row j = monomial coeffs (highest degree first) of L_j(x)."""
    nodes = np.asarray(nodes, dtype=np.float64)
    n = nodes.shape[0]
    Lmat = np.zeros((n, n), dtype=np.float64)
    for j in range(n):
        others = np.delete(nodes, j)
        denom = np.prod(nodes[j] - others)
        Lmat[j, :] = np.poly(others) / denom  # length n, highest degree first
    return Lmat


def _is_v5e():
    try:
        kind = jax.devices()[0].device_kind.lower()
    except Exception:
        return False
    return ("v5 lite" in kind) or ("v5e" in kind) or ("v5lite" in kind)


# --------------------------------------------------------------------------
# Pallas kernel: Horner evaluation of the per-row polynomial
# --------------------------------------------------------------------------
def _make_activation_kernel(n, compute_dtype):
    def kernel(c_ref, x_ref, o_ref):
        # c_ref : (TR, n)  monomial coefficients per row, highest degree first
        # x_ref : (TR, TM) input tile (native dtype)
        # o_ref : (TR, TM) output tile (native dtype)
        x = x_ref[...].astype(compute_dtype)
        c = c_ref[...].astype(compute_dtype)
        acc = c[:, 0:1]                           # (TR, 1)
        for m in range(1, n):                     # Horner: n-1 fused mul-adds
            acc = acc * x + c[:, m:m + 1]         # coeff broadcast over lanes
        o_ref[...] = jnp.broadcast_to(acc, x.shape).astype(o_ref.dtype)
    return kernel


def polynomial_activation(x, weight, nodes, *, max_tile_m=2048, max_tile_r=None):
    """x: (N, D, *spatial). weight: (1, D, n, 1). nodes: (n,) numpy array."""
    orig_shape = x.shape
    N, D = x.shape[0], x.shape[1]
    M = int(np.prod(x.shape[2:])) if x.ndim > 2 else 1
    n = int(np.asarray(nodes).shape[0])
    R = N * D
    itemsize = int(np.dtype(x.dtype).itemsize)

    # NOTE: row r of x.reshape(N*D, M) is channel (r % D); this relies on the
    # module's (N, D, *spatial) contiguous layout.
    x2 = x.reshape(R, M)  # free (contiguous) reshape; native dtype in HBM
    # TODO(synk): for spatial-free inputs (x.ndim == 2, M == 1) a lane-major
    # layout (D on lanes) would avoid heavily-masked 128-wide stores.

    is_v5e = _is_v5e()
    if max_tile_r is None:
        max_tile_r = 256 if is_v5e else 512
    vmem_limit = (28 if is_v5e else 48) * 1024 * 1024
    try:
        phys = pltpu.get_tpu_info().vmem_capacity_bytes
        vmem_limit = min(vmem_limit, int(phys) * 3 // 4)
    except Exception:
        pass

    # bf16 Horner on chips with a bf16 VALU (v6e / v7x); f32 everywhere else.
    compute_dtype = (jnp.bfloat16
                     if (x.dtype == jnp.bfloat16 and not is_v5e)
                     else jnp.float32)

    # Lagrange weights -> per-channel monomial coefficients (highest degree first).
    # TODO(synk): monomial/Horner form is ill-conditioned for large n; for
    # n_degree > ~7 switch to barycentric Lagrange evaluation in the kernel.
    Lmat = jnp.asarray(lagrange_to_monomial(nodes), dtype=jnp.float32)   # (n, n)
    w2 = weight.reshape(D, n).astype(jnp.float32)                        # (D, n)
    coeff = w2 @ Lmat                                                    # (D, n)

    def round_up(a, b):
        return ((a + b - 1) // b) * b

    # Sub-32-bit dtypes pack along sublanes: keep row tiles aligned to the packing.
    align = {4: 8, 2: 16, 1: 32}.get(itemsize, 8)
    TM = min(round_up(M, 128), max_tile_m)       # lane-dense output tiles

    base = math.lcm(align, D)
    if base <= max_tile_r:
        # Row tiles are multiples of D, so every tile starts at channel 0 and a
        # single (TR, n) coefficient pattern is valid for all tiles: constant
        # index_map -> DMA'd once, resident in VMEM for the whole grid.
        TR = min((max_tile_r // base) * base, round_up(R, base))
        assert TR % D == 0
        coeff_arg = jnp.tile(coeff, (TR // D, 1))                        # (TR, n)
        coeff_spec = pl.BlockSpec((TR, n), lambda r, m: (0, 0))
    else:
        # D too large for one row tile: fall back to per-row coefficients.
        TR = min(round_up(R, align), max_tile_r)
        coeff_arg = jnp.tile(coeff, (N, 1))                              # (R, n)
        coeff_spec = pl.BlockSpec((TR, n), lambda r, m: (r, 0))

    # Give both v7x TensorCores work when the whole problem fits a single block.
    if pl.cdiv(R, TR) == 1 and pl.cdiv(M, TM) == 1 and M > 128:
        TM = round_up(pl.cdiv(M, 2), 128)

    grid = (pl.cdiv(R, TR), pl.cdiv(M, TM))

    cost = pl.CostEstimate(
        flops=2 * (n - 1) * R * M,
        transcendentals=0,
        bytes_accessed=2 * R * M * itemsize + int(coeff_arg.shape[0]) * n * 4,
    )

    out = pl.pallas_call(
        _make_activation_kernel(n, compute_dtype),
        out_shape=jax.ShapeDtypeStruct((R, M), x.dtype),
        grid_spec=pltpu.PrefetchScalarGridSpec(
            num_scalar_prefetch=0,
            grid=grid,
            in_specs=[
                coeff_spec,                                    # coefficients
                pl.BlockSpec((TR, TM), lambda r, m: (r, m)),   # x tile
            ],
            out_specs=pl.BlockSpec((TR, TM), lambda r, m: (r, m)),
        ),
        compiler_params=pltpu.CompilerParams(
            dimension_semantics=("parallel", "parallel"),
            vmem_limit_bytes=vmem_limit),
        cost_estimate=cost,
    )(coeff_arg, x2)

    return out.reshape(orig_shape)


# --------------------------------------------------------------------------
# Pure-JAX reference (mirrors the PyTorch forward exactly: Lagrange products)
# --------------------------------------------------------------------------
def reference_activation(x, weight, nodes):
    N, D = x.shape[0], x.shape[1]
    M = int(np.prod(x.shape[2:])) if x.ndim > 2 else 1
    xf = x.reshape(N, D, M).astype(jnp.float32)
    n = int(nodes.shape[0])
    basis = []
    for j in range(n):
        num = jnp.ones_like(xf)
        den = 1.0
        for k in range(n):
            if k != j:
                num = num * (xf - float(nodes[k]))
                den = den * (float(nodes[j]) - float(nodes[k]))
        basis.append(num / den)
    B = jnp.stack(basis, axis=2)                       # (N, D, n, M)
    L = (weight.astype(jnp.float32) * B).sum(axis=2)   # (N, D, M)
    return L.reshape(x.shape)


if __name__ == "__main__":
    # Module config: Activation(input_size=D, n_degree=3) -> n = 4 basis nodes.
    N_batch, D, H, W = 2, 4, 16, 16
    n_degree = 3
    n = n_degree + 1
    radius = calc_radius(n)
    nodes = chebyshev_nodes(n, -radius, radius)        # (n,)

    key = jax.random.PRNGKey(0)
    kx, kw = jax.random.split(key)
    x = jax.random.normal(kx, (N_batch, D, H, W), dtype=jnp.float32)
    # PyTorch inits weight to zeros; use a deterministic non-zero init so the
    # kernel computes something non-trivial.
    weight = 0.1 * jax.random.normal(kw, (1, D, n, 1), dtype=jnp.float32)

    out = polynomial_activation(x, weight, nodes)
    out = jax.block_until_ready(out)

    ref = reference_activation(x, weight, nodes)
    np.testing.assert_allclose(np.asarray(out), np.asarray(ref),
                               rtol=1e-4, atol=1e-4)
    assert out.shape == x.shape and out.dtype == x.dtype
    print("KERNEL_OK")
</pallas_src>

<mosaic_0001>
module attributes {stable_mosaic.version = 11 : i64} {
  func.func @kernel(%arg0: i32, %arg1: i32, %arg2: memref<8x4xf32, #tpu.memory_space<vmem>>, %arg3: memref<8x128xf32, #tpu.memory_space<vmem>>, %arg4: memref<8x128xf32, #tpu.memory_space<vmem>>) attributes {dimension_semantics = [#tpu.dimension_semantics<parallel>, #tpu.dimension_semantics<parallel>], iteration_bounds = array<i64: 1, 2>, scalar_prefetch = 0 : i64, scratch_operands = 0 : i64, tpu.core_type = #tpu.core_type<tc>, window_params = [{pipeline_mode = #tpu.pipeline_mode<synchronous>, transform_indices = @transform_0, window_bounds = array<i64: 8, 4>}, {transform_indices = @transform_1, window_bounds = array<i64: 8, 128>}, {transform_indices = @transform_2, window_bounds = array<i64: 8, 128>}]} {
    %c0 = arith.constant 0 : index
    %c0_0 = arith.constant 0 : index
    %0 = vector.load %arg3[%c0, %c0_0] : memref<8x128xf32, #tpu.memory_space<vmem>>, vector<8x128xf32>
    %c0_1 = arith.constant 0 : index
    %c0_2 = arith.constant 0 : index
    %1 = vector.load %arg2[%c0_1, %c0_2] : memref<8x4xf32, #tpu.memory_space<vmem>>, vector<8x4xf32>
    %2 = vector.extract_strided_slice %1 {offsets = [0, 0], sizes = [8, 1], strides = [1, 1]} : vector<8x4xf32> to vector<8x1xf32>
    %3 = vector.broadcast %2 : vector<8x1xf32> to vector<8x128xf32>
    %4 = arith.mulf %3, %0 : vector<8x128xf32>
    %5 = vector.extract_strided_slice %1 {offsets = [0, 1], sizes = [8, 1], strides = [1, 1]} : vector<8x4xf32> to vector<8x1xf32>
    %6 = vector.broadcast %5 : vector<8x1xf32> to vector<8x128xf32>
    %7 = arith.addf %4, %6 : vector<8x128xf32>
    %8 = arith.mulf %7, %0 : vector<8x128xf32>
    %9 = vector.extract_strided_slice %1 {offsets = [0, 2], sizes = [8, 1], strides = [1, 1]} : vector<8x4xf32> to vector<8x1xf32>
    %10 = vector.broadcast %9 : vector<8x1xf32> to vector<8x128xf32>
    %11 = arith.addf %8, %10 : vector<8x128xf32>
    %12 = arith.mulf %11, %0 : vector<8x128xf32>
    %13 = vector.extract_strided_slice %1 {offsets = [0, 3], sizes = [8, 1], strides = [1, 1]} : vector<8x4xf32> to vector<8x1xf32>
    %14 = vector.broadcast %13 : vector<8x1xf32> to vector<8x128xf32>
    %15 = arith.addf %12, %14 : vector<8x128xf32>
    %c0_3 = arith.constant 0 : index
    %c0_4 = arith.constant 0 : index
    %16 = vector.load %arg4[%c0_3, %c0_4] : memref<8x128xf32, #tpu.memory_space<vmem>>, vector<8x128xf32>
    tpu.vector_store %arg4[%c0_3, %c0_4], %15 {strides = array<i32>} : memref<8x128xf32, #tpu.memory_space<vmem>>, vector<8x128xf32>,
    return
  }
  func.func @transform_0(%arg0: i32, %arg1: i32) -> (i32, i32) {
    %c0_i32 = arith.constant 0 : i32
    %c0_i32_0 = arith.constant 0 : i32
    %c0_i32_1 = arith.constant 0 : i32
    return %c0_i32, %c0_i32_0 : i32, i32
  }
  func.func @transform_1(%arg0: i32, %arg1: i32) -> (i32, i32) {
    %c0_i32 = arith.constant 0 : i32
    return %arg0, %arg1 : i32, i32
  }
  func.func @transform_2(%arg0: i32, %arg1: i32) -> (i32, i32) {
    %c0_i32 = arith.constant 0 : i32
    return %arg0, %arg1 : i32, i32
  }
}

</mosaic_0001>

<bundles_post_ra>
// kernel: tpu_custom_call.1
= control target key start
LH: loop header
LB: loop body
LE: loop exit
PB: predicated region body
PF: predicated region fallthrough
CT: control target
= control target key end

     0   :  { %7 = vsyncpa [#allocation3], 0  ;;  %s695_s0 = inlined_call_operand.vmem [shape: f32[8,4], index: 0, kind: input, shape index: {}]   ;;  %s696_s1 = inlined_call_operand.hbm [shape: f32[8,256], index: 1, kind: input, shape index: {}]   ;;  %s697_s2 = inlined_call_operand.hbm [shape: f32[8,256], index: 2, kind: output, shape index: {}]  }
   0x1   :  { %9 = vsyncpa [#allocation3 + $0x1], 0 }
   0x2   :  { %10 = vsyncpa [#allocation4], 0 }
   0x3   :  { %12 = vsyncpa [#allocation4 + $0x1], 0  ;;  %s520_s9 = smov 0   ;;  %s522_s10 = smov 0  }
   0x4   :  { %s524_s11 = smov 0   ;;  %s526_s12 = smov 0  }
   0x5   :  { %s528_s13 = smov 0   ;;  %s530_s14 = smov 0  }
   0x6 LB: > { %s301_s15 = sadd.s32 4294967295, %s497_s14   ;;  %s302_s16 = sadd.s32 4294967294, %s497_s14   ;;  %s497_s14 = sphi %s530_s14, %s18_s14   ;;  %s493_s13 = sphi %s528_s13, %s713_s13   ;;  %s489_s12 = sphi %s526_s12, %s712_s12   ;;  %s485_s11 = sphi %s524_s11, %s711_s11   ;;  %s481_s10 = sphi %s522_s10, %s710_s10   ;;  %s477_s9 = sphi %s520_s9, %s709_s9  }
   0x7   : > { %s27_s17 = sadd.s32 1, %s493_s13  ;;  %s60_s18 = sadd.s32 1, %s485_s11 }
   0x8   : > { %p28_p0 = scmp.ge.s32.totalorder %s27_s17, 2  ;;  %p67_p1 = scmp.ne.s32.totalorder %s485_s11, %s481_s10 }
   0x9   : > { %p68_p2 = scmp.eq.s32.totalorder %s497_s14, 0  ;;  %p73_p3 = scmp.ne.s32.totalorder %s481_s10, %s477_s9 }
   0xa   : > { %s715_s17 = smov (%p28_p0, %s27_s17), 0  ;;  %p74_p5 = scmp.eq.s32.totalorder %s301_s15, 0 }
   0xb   : > { %p561_p4 = por %p68_p2, %p67_p1  ;;  %s56_s20 = ssub.s32 %s493_s13, %s715_s17 }
   0xc   : > { %p99_p6 = scmp.eq.s32.totalorder %s301_s15, 1  ;;  %p58_p7 = scmp.eq.s32.totalorder %s56_s20, 0 }
   0xd   : > { %p567_p8 = por %p74_p5, %p73_p3  ;;  %p105_p10 = scmp.eq.s32.totalorder %s302_s16, 1 }
   0xe   : > { %p571_p9 = por %p99_p6, %p67_p1  ;;  %p326_p13 = scmp.lt.s32.totalorder %s497_s14, 2 }
   0xf   : > { %s576_s23 = scalar_select %p58_p7, %s485_s11, %s60_s18  }
  0x10   : > { %s701_s22 = scalar_select %p571_p9, 1, 0 }
  0x11   : > { %p578_p11 = por %p105_p10, %p73_p3  ;;  %s128_s25 = sand.u32 1, %s485_s11  }
  0x12   : > { %s305_s26 = sshll.u32 %s128_s25, 3  ;;  %s306_s27 = sshll.u32 %s493_s13, 7 }
  0x13   : > { %s702_s24 = scalar_select %p578_p11, 1, 0 }
  0x14   : > { %s589_s30 = scalar_lea.hbm %s696_s1, %s306_s27  ;;  %s132_s3 = scalar_lea.vmem [#allocation2], %s305_s26 }
  0x15   : > { %s141_s4 = sshll.u32 %s132_s3, 4  ;;  %p595_p0 = pnand %p326_p13, %p561_p4  ;;  %s591_s4 = int_to_ptr.vmem [resolvable:$true] %s141_s4 }
  0x16   : > { %s129_s6 = scalar_lea.sflag [#allocation3], %s128_s25  ;;  %s385_s7 = scalar_lea.hbm %s589_s30, 128 }
  0x17   : > { %p386_p3 = scmp.ne.s32.totalorder %s589_s30, %s385_s7  ;;  %p387_p5 = pneg %p595_p0 }
  0x18   : > { %s390_s16 = scalar_lea.hbm %s696_s1, 256  ;;  %p391_p4 = scmp.lt.u32.totalorder %s589_s30, %s696_s1 }
  0x19   : > { %p388_p6 = pnand %p387_p5, %p386_p3  ;;  %p392_p10 = scmp.lt.u32.totalorder %s390_s16, %s385_s7 }
  0x1a   : > { %p394_p12 = scmp.lt.u32.totalorder %s385_s7, %s589_s30 }
  0x1b   : > { %p389_p7 = pneg %p388_p6  ;;  %p393_p13 = por %p392_p10, %p391_p4 }
  0x1d   : > { %p395_p1 = por %p394_p12, %p393_p13 }
  0x1f   : > { %p396_p2 = pnand %p395_p1, %p389_p7 }
  0x21   : > { %399 = shalt.err (!%p396_p2)
}
  0x22   : > { %s400_s20 = scalar_lea.vmem %s591_s4, 128  ;;  %s499_s25 = smov [#allocation2]  }
  0x23   : > { %p401_p3 = scmp.ne.s32.totalorder %s591_s4, %s400_s20  ;;  %s405_s26 = sshll.u32 %s499_s25, 4  ;;  %s406_s26 = int_to_ptr.vmem [resolvable:$false] %s405_s26 }
  0x24   : > { %s407_s27 = scalar_lea.vmem %s406_s26, 256  ;;  %p408_p9 = scmp.lt.s32.totalorder %s591_s4, %s406_s26 }
  0x25   : > { %p403_p6 = pnand %p401_p3, %p387_p5  ;;  %p409_p4 = scmp.lt.s32.totalorder %s407_s27, %s400_s20 }
  0x27   : > { %p404_p11 = pneg %p403_p6  ;;  %p410_p10 = por %p409_p4, %p408_p9 }
  0x29   : > { %p411_p12 = pnand %p410_p10, %p404_p11 }
  0x2b   : > { %414 = shalt.err (!%p411_p12)
}
  0x2c   : > { %321 = dma.hbm_to_vmem [thread:$0]  (!%p595_p0), %s589_s30, 128, %s591_s4, %s129_s6  }
  0x2d   : > { %p704_p1 = scmp.lt.s32.totalorder %s497_s14, 3  ;;  %p705_p2 = scmp.ge.s32.totalorder %s497_s14, 1 }
  0x2f   : > { %p147_p5 = pnand %p705_p2, %p704_p1 }
  0x30   : > { %s631_s28 = sand.u32 (!%p147_p5), 1, %s481_s10  }
  0x31   : > { %150 = sbr.rel (%p147_p5) target bundleno = 216 (0xd8), region = 28  ;;  %s308_s29 = sshll.u32 (!%p147_p5), %s631_s28, 3 }
  0x32   : > { %s153_s3 = scalar_lea.sflag (!%p147_p5), [#allocation3], %s631_s28  ;;  %s156_s7 = scalar_lea.vmem (!%p147_p5), [#allocation2], %s308_s29 }
  0x38   : > { %468 = dma.done.wait (%p567_p8), %s153_s3, 128  }
  0x39   : > { %470 = vsyncadd (%p567_p8), %s153_s3, 4294967168  ;;  %v500_v0 = vmov 0   ;;  %v501_v1 = vmov 2   ;;  %v178_v2 = vld [vmem:[%s695_s0] sm:$0xff]  ;;  %v502_v3 = vmov 1   ;;  %v503_v4 = vmov 3  }
  0x3a   : > { %380 = vset.pattern.permute.xlu0 %v500_v0  ;;  %382 = vset.pattern.permute.xlu1 %v501_v1  ;;  %v177_v6 = vld [vmem:[%s156_s7] sm:$0xff]  ;;  %s311_s21 = sshll.u32 %s489_s12, 7  ;;  %s176_s5 = scalar_lea.vmem [#allocation5], %s308_s29 }
  0x3b   : > { %181 = vperm.xlu0 %380, %v178_v2   ;;  %192 = vperm.xlu1 %382, %v178_v2   ;;  %s219_s6 = sshll.u32 %s176_s5, 4  ;;  %s646_s16 = scalar_lea.hbm %s697_s2, %s311_s21  ;;  %s648_s6 = int_to_ptr.vmem [resolvable:$true] %s219_s6 }
  0x3c   : > { %s204_s18 = scalar_lea.sflag [#allocation4], %s631_s28  ;;  %s415_s19 = scalar_lea.vmem %s648_s6, 128 }
  0x3d   : > { %p416_p8 = scmp.ne.s32.totalorder %s648_s6, %s415_s19  ;;  %p706_p9 = scmp.ne.s32.totalorder %s701_s22, 0 }
  0x3e   : > { %s504_s12 = smov [#allocation5]  }
  0x3f   : > { %381 = vset.pattern.permute.xlu0 %v502_v3  ;;  %383 = vset.pattern.permute.xlu1 %v503_v4  ;;  %p417_p11 = pnand %p416_p8, %p706_p9  ;;  %s419_s20 = sshll.u32 %s504_s12, 4  ;;  %s420_s20 = int_to_ptr.vmem [resolvable:$false] %s419_s20 }
  0x40   : > { %186 = vperm.xlu0 %381, %v178_v2   ;;  %198 = vperm.xlu1 %383, %v178_v2   ;;  %s421_s25 = scalar_lea.vmem %s420_s20, 256  ;;  %p422_p7 = scmp.lt.s32.totalorder %s648_s6, %s420_s20 }
  0x41   : > { %p418_p0 = pneg %p417_p11  ;;  %p423_p13 = scmp.lt.s32.totalorder %s421_s25, %s415_s19 }
  0x43   : > { %p424_p3 = por %p423_p13, %p422_p7 }
  0x44   : > { %384 = vset.pattern.permute.xlu0 %v503_v4 }
  0x45   : > { %p425_p6 = pnand %p424_p3, %p418_p0 }
  0xba   : > { %v182_v5 = vpop.permute.xlu0 %181  ;;  %v193_v9 = vpop.permute.xlu1 %192 }
  0xbb   : > { %v184_v7 = vmul.f32 %v182_v5, %v177_v6 }
  0xbf   : > { %v187_v8 = vpop.permute.xlu0 %186  ;;  %v199_v13 = vpop.permute.xlu1 %198 }
  0xc0   : > { %v189_v10 = vadd.f32 %v187_v8, %v184_v7 }
  0xc2   : > { %v190_v11 = vmul.f32 %v189_v10, %v177_v6 }
  0xc4   : > { %v195_v12 = vadd.f32 %v193_v9, %v190_v11 }
  0xc6   : > { %v196_v14 = vmul.f32 %v195_v12, %v177_v6 }
  0xc8   : > { %v201_v15 = vadd.f32 %v199_v13, %v196_v14 }
  0xca   : > { %202 = vst [vmem:[%s176_s5] sm:$0xff] %v201_v15 }
  0xcb   : > { %428 = shalt.err (!%p425_p6)
}
  0xcc   : > { %s429_s26 = scalar_lea.hbm %s646_s16, 128  ;;  %s433_s29 = scalar_lea.hbm %s697_s2, 256 }
  0xcd   : > { %p430_p4 = scmp.ne.s32.totalorder %s646_s16, %s429_s26  ;;  %p434_p1 = scmp.lt.u32.totalorder %s646_s16, %s697_s2 }
  0xce   : > { %p435_p2 = scmp.lt.u32.totalorder %s433_s29, %s429_s26  ;;  %p437_p8 = scmp.lt.u32.totalorder %s429_s26, %s646_s16 }
  0xcf   : > { %p431_p10 = pnand %p430_p4, %p706_p9 }
  0xd0   : > { %p436_p5 = por %p435_p2, %p434_p1 }
  0xd1   : > { %p432_p12 = pneg %p431_p10 }
  0xd2   : > { %p438_p11 = por %p437_p8, %p436_p5 }
  0xd4   : > { %p439_p0 = pnand %p438_p11, %p432_p12 }
  0xd6   : > { %442 = shalt.err (!%p439_p0)
}
  0xd7   : > { %316 = dma.vmem_to_hbm [thread:$0]  (%p706_p9), %s648_s6, 128, %s646_s16, %s204_s18  }
  0xd8 PF: > { %s231_s30 = sand.u32 1, %s477_s9   ;;  %p707_p7 = scmp.ne.s32.totalorder %s702_s24, 0 }
  0xd9   : > { %p708_p13 = scmp.ge.s32.totalorder %s497_s14, 2  ;;  %s232_s4 = scalar_lea.sflag [#allocation4], %s231_s30 }
  0xdb   : > { %p323_p3 = pnand %p708_p13, %p707_p7 }
  0xdd   : > { %472 = dma.done.wait (!%p323_p3), %s232_s4, 128  }
  0xde   : > { %474 = vsyncadd (!%p323_p3), %s232_s4, 4294967168  ;;  %s18_s14 = sadd.s32 1, %s497_s14   ;;  %s709_s9 = smov %s481_s10 }
  0xdf   : > { %p15_p6 = scmp.ge.s32.totalorder %s18_s14, 4   ;;  %s710_s10 = smov %s485_s11 }
  0xe0   : > { %s711_s11 = smov %s576_s23  ;;  %s712_s12 = smov %s493_s13 }
  0xe1   : > { %s713_s13 = smov %s715_s17  ;;  %17 = sbr.rel (!%p15_p6) target bundleno = 6 (0x6), region = 73 }
  0xe8   :  { %237 = vsyncpa [#allocation3], 1 }
  0xe9   :  { %239 = vsyncpa [#allocation3 + $0x1], 1 }
  0xea   :  { %240 = vsyncpa [#allocation4], 1 }
  0xeb   :  { %242 = vsyncpa [#allocation4 + $0x1], 1 }

</bundles_post_ra>
